<compile_context>
chip_gen: v7x
topology: tpu7x:2x2x1
jax: 0.10.0
libtpu: 0.0.40
codegen_flags: <defaults>
</compile_context>

<pallas_src>
import functools

import jax
import jax.numpy as jnp
from jax import lax
from jax.experimental import pallas as pl
from jax.experimental.pallas import tpu as pltpu

F_IN = 1024   # feature dim expected by the Linear layers (nn.Linear(1024, .))
N_OUT = 8     # fused output rows: [cls(1) | reg(4) | zero pad(3)]
_LANE = 128


def _roi_kernel(x_ref, w_ref, b_ref, o_ref, *, compute_dtype):
    # x_ref: (tm, 1024)  w_ref: (8, 1024)  b_ref: (8, 1)  o_ref: (8, tm)
    x = x_ref[...].astype(compute_dtype)
    w = w_ref[...].astype(compute_dtype)
    # (8, 1024) . (tm, 1024) contracting both last dims -> (8, tm).
    acc = lax.dot_general(
        w, x,
        dimension_numbers=(((1,), (1,)), ((), ())),
        preferred_element_type=jnp.float32,
    )
    o_ref[...] = (acc + b_ref[...]).astype(o_ref.dtype)


def fuse_roi_params(w_cls, b_cls, w_reg, b_reg):
    """Fuse the cls/reg heads into one (8, 1024) weight + (8, 1) bias.

    PyTorch nn.Linear stores (out, in); we keep that layout (lane-dense on
    TPU) and simply stack rows: row 0 = cls, rows 1:5 = reg, rows 5:8 = 0.
    Call once at model setup, not per forward.
    """
    f = w_cls.shape[-1]
    w_fused = jnp.concatenate(
        [w_cls.astype(jnp.float32),
         w_reg.astype(jnp.float32),
         jnp.zeros((N_OUT - 5, f), jnp.float32)], axis=0)
    b_fused = jnp.concatenate(
        [b_cls.astype(jnp.float32).reshape(-1),
         b_reg.astype(jnp.float32).reshape(-1),
         jnp.zeros((N_OUT - 5,), jnp.float32)], axis=0).reshape(N_OUT, 1)
    return w_fused, b_fused


def _round_up(n, a):
    return ((n + a - 1) // a) * a


def roi_forward(x, w_fused, b_fused, *, tm=2048, mxu_bf16=True):
    """Pallas equivalent of ROI.forward.

    x:        (B, N, ...) with prod(trailing dims) == 1024
    w_fused:  (8, 1024)   b_fused: (8, 1)   (from fuse_roi_params)
    returns (cls, reg) with shapes (B, N, 1), (B, N, 4), dtype == x.dtype.

    mxu_bf16=True feeds the MXU bf16 operands with f32 accumulation: numerics
    differ from exact f32 only by bf16 input rounding (use a ~1e-2 tolerance
    against an f32 reference). mxu_bf16=False keeps exact f32 MXU math.
    """
    B, N = x.shape[0], x.shape[1]
    M = B * N
    x2 = x.reshape(M, -1)
    F = x2.shape[1]
    assert F == F_IN and w_fused.shape == (N_OUT, F_IN), (
        f"expected feature dim {F_IN}, got {F}")
    out_dtype = x.dtype
    compute_dtype = jnp.bfloat16 if mxu_bf16 else x2.dtype

    # --- Row tiling. Ragged M handled via a partial trailing block (no pad).
    tm = max(_LANE, (int(tm) // _LANE) * _LANE)
    if M <= tm:
        tm_eff = M                     # single full-extent block (always legal)
    else:
        tm_eff = tm                    # multiple of 128 -> legal partial tail
    if M > 2 * _LANE:
        # Keep >= 2 grid steps so both v7x TensorCores get work.
        tm_eff = min(tm_eff, _round_up(pl.cdiv(M, 2), _LANE))
    grid = (pl.cdiv(M, tm_eff),)

    # VMEM budget: double-buffered X tile dominates; leave compiler headroom,
    # never exceed ~45 MiB (v7x has only 64 MiB physical VMEM).
    itemsize = jnp.dtype(x2.dtype).itemsize
    x_tile_bytes = tm_eff * F * itemsize
    vmem_limit = int(min(45 << 20, max(32 << 20, 2 * x_tile_bytes + (8 << 20))))

    cost = pl.CostEstimate(
        flops=2 * M * F * N_OUT,
        transcendentals=0,
        bytes_accessed=(M * F * itemsize        # X read (dominant, HBM-bound)
                        + N_OUT * F * 4         # fused weight
                        + N_OUT * 4             # fused bias
                        + N_OUT * M * 4),       # transposed fused output
    )

    fused_out = pl.pallas_call(
        functools.partial(_roi_kernel, compute_dtype=compute_dtype),
        out_shape=jax.ShapeDtypeStruct((N_OUT, M), out_dtype),
        grid_spec=pl.GridSpec(
            grid=grid,
            in_specs=[
                pl.BlockSpec((tm_eff, F), lambda i: (i, 0)),   # X row tile
                pl.BlockSpec((N_OUT, F), lambda i: (0, 0)),    # fused weight
                pl.BlockSpec((N_OUT, 1), lambda i: (0, 0)),    # fused bias
            ],
            out_specs=pl.BlockSpec((N_OUT, tm_eff), lambda i: (0, i)),
        ),
        compiler_params=pltpu.CompilerParams(
            dimension_semantics=("parallel",),
            vmem_limit_bytes=vmem_limit,
        ),
        cost_estimate=cost,
    )(x2, w_fused, b_fused)

    # fused_out: (8, M), lane-dense.  Row 0 = cls, rows 1:5 = reg, 5:8 = pad.
    cls_out = fused_out[0].reshape(B, N, 1)
    reg_out = fused_out[1:5].T.reshape(B, N, 4)
    return cls_out, reg_out


if __name__ == "__main__":
    key = jax.random.PRNGKey(0)
    k_x, k_wc, k_bc, k_wr, k_br = jax.random.split(key, 5)

    B, N = 2, 8  # x.view(B*N, -1) -> (16, 1024)
    x = jax.random.normal(k_x, (B, N, F_IN), dtype=jnp.float32)

    # Deterministic params mimicking nn.Linear's U(-1/sqrt(in), 1/sqrt(in)).
    bound = 1.0 / (F_IN ** 0.5)
    w_cls = jax.random.uniform(k_wc, (1, F_IN), jnp.float32, -bound, bound)
    b_cls = jax.random.uniform(k_bc, (1,), jnp.float32, -bound, bound)
    w_reg = jax.random.uniform(k_wr, (4, F_IN), jnp.float32, -bound, bound)
    b_reg = jax.random.uniform(k_br, (4,), jnp.float32, -bound, bound)

    # Build fused params once (outside the per-call path).
    w_fused, b_fused = fuse_roi_params(w_cls, b_cls, w_reg, b_reg)

    roi_bf16 = jax.jit(roi_forward)                                    # default bf16 MXU feed
    roi_f32 = jax.jit(functools.partial(roi_forward, mxu_bf16=False))  # exact f32 path

    cls_out, reg_out = roi_bf16(x, w_fused, b_fused)
    jax.block_until_ready((cls_out, reg_out))
    assert cls_out.shape == (B, N, 1) and reg_out.shape == (B, N, 4)

    # Reference in plain JAX (same math as the PyTorch module).
    x2 = x.reshape(B * N, F_IN)
    cls_ref = (x2 @ w_cls.T + b_cls).reshape(B, N, 1)
    reg_ref = (x2 @ w_reg.T + b_reg).reshape(B, N, 4)

    # bf16-fed MXU: accurate to bf16 input rounding -> looser tolerance.
    assert jnp.allclose(cls_out, cls_ref, atol=3e-2, rtol=3e-2)
    assert jnp.allclose(reg_out, reg_ref, atol=3e-2, rtol=3e-2)

    # Exact-f32 MXU path: tight tolerance.
    cls32, reg32 = roi_f32(x, w_fused, b_fused)
    jax.block_until_ready((cls32, reg32))
    assert jnp.allclose(cls32, cls_ref, atol=1e-4, rtol=1e-4)
    assert jnp.allclose(reg32, reg_ref, atol=1e-4, rtol=1e-4)

    # Ragged / multi-step grid case (partial trailing block, grid >= 2).
    B2, N2 = 2, 300
    x_big = jax.random.normal(jax.random.PRNGKey(1), (B2, N2, F_IN), jnp.float32)
    cls_b, reg_b = roi_bf16(x_big, w_fused, b_fused)
    jax.block_until_ready((cls_b, reg_b))
    x2b = x_big.reshape(B2 * N2, F_IN)
    cls_rb = (x2b @ w_cls.T + b_cls).reshape(B2, N2, 1)
    reg_rb = (x2b @ w_reg.T + b_reg).reshape(B2, N2, 4)
    assert jnp.allclose(cls_b, cls_rb, atol=3e-2, rtol=3e-2)
    assert jnp.allclose(reg_b, reg_rb, atol=3e-2, rtol=3e-2)

    print("KERNEL_OK")
</pallas_src>

<mosaic_0001>
module attributes {stable_mosaic.version = 11 : i64} {
  func.func @_roi_kernel(%arg0: i32, %arg1: memref<16x1024xf32, #tpu.memory_space<vmem>>, %arg2: memref<8x1024xf32, #tpu.memory_space<vmem>>, %arg3: memref<8x1xf32, #tpu.memory_space<vmem>>, %arg4: memref<8x16xf32, #tpu.memory_space<vmem>>) attributes {dimension_semantics = [#tpu.dimension_semantics<parallel>], iteration_bounds = array<i64: 1>, scalar_prefetch = 0 : i64, scratch_operands = 0 : i64, tpu.core_type = #tpu.core_type<tc>, window_params = [{transform_indices = @transform_0, window_bounds = array<i64: 16, 1024>}, {pipeline_mode = #tpu.pipeline_mode<synchronous>, transform_indices = @transform_1, window_bounds = array<i64: 8, 1024>}, {pipeline_mode = #tpu.pipeline_mode<synchronous>, transform_indices = @transform_2, window_bounds = array<i64: 8, 1>}, {transform_indices = @transform_3, window_bounds = array<i64: 8, 16>}]} {
    %c0 = arith.constant 0 : index
    %c0_0 = arith.constant 0 : index
    %0 = vector.load %arg1[%c0, %c0_0] : memref<16x1024xf32, #tpu.memory_space<vmem>>, vector<16x1024xf32>
    %1 = arith.truncf %0 : vector<16x1024xf32> to vector<16x1024xbf16>
    %c0_1 = arith.constant 0 : index
    %c0_2 = arith.constant 0 : index
    %2 = vector.load %arg2[%c0_1, %c0_2] : memref<8x1024xf32, #tpu.memory_space<vmem>>, vector<8x1024xf32>
    %3 = arith.truncf %2 : vector<8x1024xf32> to vector<8x1024xbf16>
    %cst = arith.constant dense<0.000000e+00> : vector<8x16xf32>
    %4 = tpu.matmul %3, %1, %cst {dimension_numbers = #tpu.dot_dimension_numbers<[1], [1], [0], [0], [0, 0, 1, 0], [], []>} : vector<8x1024xbf16>, vector<16x1024xbf16>, vector<8x16xf32> -> vector<8x16xf32>
    %c0_3 = arith.constant 0 : index
    %c0_4 = arith.constant 0 : index
    %5 = vector.load %arg3[%c0_3, %c0_4] : memref<8x1xf32, #tpu.memory_space<vmem>>, vector<8x1xf32>
    %6 = vector.broadcast %5 : vector<8x1xf32> to vector<8x16xf32>
    %7 = arith.addf %4, %6 : vector<8x16xf32>
    %c0_5 = arith.constant 0 : index
    %c0_6 = arith.constant 0 : index
    %8 = vector.load %arg4[%c0_5, %c0_6] : memref<8x16xf32, #tpu.memory_space<vmem>>, vector<8x16xf32>
    tpu.vector_store %arg4[%c0_5, %c0_6], %7 {strides = array<i32>} : memref<8x16xf32, #tpu.memory_space<vmem>>, vector<8x16xf32>,
    return
  }
  func.func @transform_0(%arg0: i32) -> (i32, i32) {
    %c0_i32 = arith.constant 0 : i32
    %c0_i32_0 = arith.constant 0 : i32
    return %arg0, %c0_i32 : i32, i32
  }
  func.func @transform_1(%arg0: i32) -> (i32, i32) {
    %c0_i32 = arith.constant 0 : i32
    %c0_i32_0 = arith.constant 0 : i32
    %c0_i32_1 = arith.constant 0 : i32
    return %c0_i32, %c0_i32_0 : i32, i32
  }
  func.func @transform_2(%arg0: i32) -> (i32, i32) {
    %c0_i32 = arith.constant 0 : i32
    %c0_i32_0 = arith.constant 0 : i32
    %c0_i32_1 = arith.constant 0 : i32
    return %c0_i32, %c0_i32_0 : i32, i32
  }
  func.func @transform_3(%arg0: i32) -> (i32, i32) {
    %c0_i32 = arith.constant 0 : i32
    %c0_i32_0 = arith.constant 0 : i32
    return %c0_i32, %arg0 : i32, i32
  }
}

</mosaic_0001>

<bundles_post_ra>
// kernel: squeeze.1
= control target key start
LH: loop header
LB: loop body
LE: loop exit
PB: predicated region body
PF: predicated region fallthrough
CT: control target
= control target key end

     0   :  { %s85_s0 = inlined_call_operand.vmem [shape: f32[16], index: 0, kind: input, shape index: {}]   ;;  %s86_s1 = inlined_call_operand.hbm [shape: f32[2,8,1], index: 1, kind: output, shape index: {}]  }
   0x1   :  { %v5_v0 = vld [vmem:[%s85_s0] sm:$0x1] }
   0x2   :  { %2 = vsyncpa [#allocation1], 0  ;;  %6 = vst [vmem:[#allocation3] sm:$0x1] %v5_v0  ;;  %vm8_vm0 = vcmask 64512   ;;  %s58_s0 = smov 120  }
   0x3   :  { %s59_s8 = smov [#allocation0]  }
   0x4   :  { %s26_s9 = sshll.u32 %s59_s8, 4  ;;  %s27_s9 = int_to_ptr.vmem [resolvable:$true] %s26_s9 }
   0x5   :  { %s34_s10 = scalar_lea.vmem %s27_s9, 32  ;;  %p39_p1 = scmp.lt.s32.totalorder %s27_s9, %s27_s9 }
   0x6   :  { %p35_p0 = scmp.ne.s32.totalorder %s27_s9, %s34_s10  ;;  %p40_p2 = scmp.lt.s32.totalorder %s34_s10, %s34_s10 }
   0x8   :  { %p41_p3 = por %p40_p2, %p39_p1 }
   0x9   :  { %v10_v1 = vld [vmem:[#allocation3] sm:$0x1]  }
   0xa   :  { %v7_v2 = vld [vmem:[#allocation3] sm:$0x1]   ;;  %11 = vrot.lane.b32.xlu0 %v10_v1, %s58_s0  ;;  %p42_p4 = pnand %p41_p3, %p35_p0 }
   0xb   :  { %9 = vst.msk [vmem:[#allocation2] sm:$0x1] %vm8_vm0, %v7_v2  }
  0x7c   :  { %v12_v3 = vpop.permute.xlu0 %11  }
  0x7d   :  { %15 = vst.msk [vmem:[#allocation2 + $0x1] sm:$0x1] %vm8_vm0, %v12_v3  }
  0x84   :  { %v19_v4 = vld [vmem:[#allocation2] sm:$0x3] }
  0x85   :  { %21 = vst [vmem:[#allocation0] sm:$0x3] %v19_v4 }
  0x86   :  { %45 = shalt.err (!%p42_p4)
}
  0x87   :  { %s46_s13 = scalar_lea.hbm %s86_s1, 32 }
  0x88   :  { %p47_p5 = scmp.ne.s32.totalorder %s86_s1, %s46_s13  ;;  %p50_p6 = scmp.lt.u32.totalorder %s46_s13, %s86_s1 }
  0x8a   :  { %p52_p7 = pnand %p50_p6, %p47_p5 }
  0x8c   :  { %55 = shalt.err (!%p52_p7)
}
  0x8d   :  { %29 = dma.vmem_to_hbm [thread:$0]  %s27_s9, 32, %s86_s1, [#allocation1]  }
  0x8e   :  { %56 = dma.done.wait [#allocation1], 32  }
  0x8f   :  { %57 = vsyncadd [#allocation1], 4294967264 }
  0x90   :  { %31 = vsyncpa [#allocation1], 1 }

// kernel: roi_forward.1
= control target key start
LH: loop header
LB: loop body
LE: loop exit
PB: predicated region body
PF: predicated region fallthrough
CT: control target
= control target key end

     0   :  { %8 = vsyncpa [#allocation3], 0  ;;  %s374_s0 = inlined_call_operand.hbm [shape: f32[16,1024], index: 0, kind: input, shape index: {}]   ;;  %s375_s1 = inlined_call_operand.hbm [shape: f32[8,1024], index: 1, kind: input, shape index: {}]   ;;  %s376_s2 = inlined_call_operand.vmem [shape: f32[8,1], index: 2, kind: input, shape index: {}]   ;;  %s377_s3 = inlined_call_operand.vmem [shape: f32[8,16], index: 3, kind: output, shape index: {}]  }
   0x1   :  { %9 = vsyncpa [#allocation5], 0  ;;  %s319_s12 = smov [#allocation2]   ;;  %s271_s16 = scalar_lea.hbm %s374_s0, 2048 }
   0x2   :  { %s15_s13 = sshll.u32 %s319_s12, 4  ;;  %p272_p0 = scmp.ne.s32.totalorder %s374_s0, %s271_s16  ;;  %s16_s13 = int_to_ptr.vmem [resolvable:$true] %s15_s13 }
   0x3   :  { %p275_p1 = scmp.lt.u32.totalorder %s271_s16, %s374_s0 }
   0x5   :  { %p277_p2 = pnand %p275_p1, %p272_p0 }
   0x7   :  { %280 = shalt.err (!%p277_p2)
}
   0x8   :  { %s281_s21 = scalar_lea.vmem %s16_s13, 2048  ;;  %p286_p4 = scmp.lt.s32.totalorder %s16_s13, %s16_s13 }
   0x9   :  { %p282_p3 = scmp.ne.s32.totalorder %s16_s13, %s281_s21  ;;  %p287_p5 = scmp.lt.s32.totalorder %s281_s21, %s281_s21 }
   0xb   :  { %p288_p6 = por %p287_p5, %p286_p4 }
   0xd   :  { %p289_p7 = pnand %p288_p6, %p282_p3 }
   0xf   :  { %292 = shalt.err (!%p289_p7)
}
  0x10   :  { %s320_s22 = smov 1024   ;;  %s321_s23 = smov 64  }
  0x11   :  { %21 = dma.hbm_to_vmem [thread:$0]  %s374_s0, 2048, %s16_s13, [#allocation3], %s320_s22, %s320_s22, %s321_s23  }
  0x12   :  { %s322_s26 = smov [#allocation4]   ;;  %s293_s30 = scalar_lea.hbm %s375_s1, 1024 }
  0x13   :  { %s28_s27 = sshll.u32 %s322_s26, 4  ;;  %p294_p8 = scmp.ne.s32.totalorder %s375_s1, %s293_s30  ;;  %s29_s27 = int_to_ptr.vmem [resolvable:$true] %s28_s27 }
  0x14   :  { %p297_p9 = scmp.lt.u32.totalorder %s293_s30, %s375_s1 }
  0x16   :  { %p299_p10 = pnand %p297_p9, %p294_p8 }
  0x18   :  { %302 = shalt.err (!%p299_p10)
}
  0x19   :  { %s303_s8 = scalar_lea.vmem %s29_s27, 1024  ;;  %p308_p12 = scmp.lt.s32.totalorder %s29_s27, %s29_s27 }
  0x1a   :  { %p304_p11 = scmp.ne.s32.totalorder %s29_s27, %s303_s8  ;;  %p309_p13 = scmp.lt.s32.totalorder %s303_s8, %s303_s8 }
  0x1c   :  { %p310_p0 = por %p309_p13, %p308_p12 }
  0x1e   :  { %p311_p1 = pnand %p310_p0, %p304_p11 }
  0x20   :  { %314 = shalt.err (!%p311_p1)
}
  0x21   :  { %31 = dma.hbm_to_vmem [thread:$0]  %s375_s1, 1024, %s29_s27, [#allocation5]  }
  0x22   :  { %315 = dma.done.wait [#allocation3], 2048  }
  0x23   :  { %316 = vsyncadd [#allocation3], 4294965248 }
  0x24   :  { %317 = dma.done.wait [#allocation5], 1024  }
  0x25   :  { %318 = vsyncadd [#allocation5], 4294966272  ;;  %v323_v0 = vmov 0   ;;  %v42_v1 = vld [vmem:[#allocation2 + $0x8] sm:$0xff]  ;;  %v41_v6 = vld [vmem:[#allocation2] sm:$0xff]  ;;  %vm247_vm0 = vcmask 130048  }
  0x26   :  { %270 = vset.pattern.permute.xlu0 %v323_v0  ;;  %v50_v2 = vld [vmem:[#allocation2 + $0x48] sm:$0xff]  ;;  %v49_v7 = vld [vmem:[#allocation2 + $0x40] sm:$0xff]  ;;  %v44_v17 = vld [vmem:[#allocation2 + $0x18] sm:$0xff] }
  0x27   :  { %v46_v3 = vld [vmem:[#allocation2 + $0x28] sm:$0xff]  ;;  %v58_v4 = vpack.c.bf16 %v50_v2, %v42_v1  ;;  %v57_v9 = vpack.c.bf16 %v49_v7, %v41_v6  ;;  %v45_v10 = vld [vmem:[#allocation2 + $0x20] sm:$0xff]  ;;  %v52_v19 = vld [vmem:[#allocation2 + $0x58] sm:$0xff] }
  0x28   :  { %v54_v5 = vld [vmem:[#allocation2 + $0x68] sm:$0xff]  ;;  %v53_v11 = vld [vmem:[#allocation2 + $0x60] sm:$0xff]  ;;  %v43_v21 = vld [vmem:[#allocation2 + $0x10] sm:$0xff]  ;;  %v60_v22 = vpack.c.bf16 %v52_v19, %v44_v17 }
  0x29   :  { %v62_v8 = vpack.c.bf16 %v54_v5, %v46_v3  ;;  %v66_v12 = vld [vmem:[#allocation4 + $0x8] sm:$0xff]  ;;  %87 = vmatprep.subr.bf16.mxu1 %v58_v4  ;;  %v61_v13 = vpack.c.bf16 %v53_v11, %v45_v10  ;;  %v65_v16 = vld [vmem:[#allocation4] sm:$0xff]  ;;  %v51_v23 = vld [vmem:[#allocation2 + $0x50] sm:$0xff] }
  0x2a   :  { %v74_v14 = vpack.c.bf16 %v66_v12, %v66_v12  ;;  %v70_v15 = vld [vmem:[#allocation4 + $0x28] sm:$0xff]  ;;  %88 = vmatpush1.bf16.xpose.msra.mxu1 %v57_v9  ;;  %v69_v20 = vld [vmem:[#allocation4 + $0x20] sm:$0xff]  ;;  %v48_v24 = vld [vmem:[#allocation2 + $0x38] sm:$0xff]  ;;  %v73_v30 = vpack.c.bf16 %v65_v16, %v65_v16  ;;  %v59_v33 = vpack.c.bf16 %v51_v23, %v43_v21 }
  0x2b   :  { %167 = vmatprep.subr.bf16.mxu0 %v62_v8  ;;  %v78_v18 = vpack.c.bf16 %v70_v15, %v70_v15  ;;  %v56_v25 = vld [vmem:[#allocation2 + $0x78] sm:$0xff]  ;;  %v47_v27 = vld [vmem:[#allocation2 + $0x30] sm:$0xff]  ;;  %127 = vmatprep.subr.bf16.mxu1 %v60_v22  ;;  %v77_v32 = vpack.c.bf16 %v69_v20, %v69_v20  ;;  %v81_v34 = vld [vmem:[%s376_s2] sm:$0xff] }
  0x2c   :  { %168 = vmatpush1.bf16.xpose.msra.mxu0 %v61_v13  ;;  %119 = vmatprep.mubr.bf16.mxu1 %v74_v14  ;;  %v64_v26 = vpack.c.bf16 %v56_v25, %v48_v24  ;;  %v55_v28 = vld [vmem:[#allocation2 + $0x70] sm:$0xff]  ;;  %v68_v29 = vld [vmem:[#allocation4 + $0x18] sm:$0xff] }
  0x2d   :  { %199 = vmatprep.mubr.bf16.mxu0 %v78_v18  ;;  %v72_v31 = vld [vmem:[#allocation4 + $0x38] sm:$0xff]  ;;  %v63_v35 = vpack.c.bf16 %v55_v28, %v47_v27  ;;  %v76_v36 = vpack.c.bf16 %v68_v29, %v68_v29  ;;  %84 = vperm.xlu0 %270, %v81_v34   ;;  %v67_v38 = vld [vmem:[#allocation4 + $0x10] sm:$0xff] }
  0x2e   :  { %207 = vmatprep.subr.bf16.mxu0 %v64_v26  ;;  %v80_v37 = vpack.c.bf16 %v72_v31, %v72_v31  ;;  %v71_v39 = vld [vmem:[#allocation4 + $0x30] sm:$0xff]  ;;  %v75_v40 = vpack.c.bf16 %v67_v38, %v67_v38 }
  0x2f   :  { %v79_v41 = vpack.c.bf16 %v71_v39, %v71_v39 }
  0x31   :  { %120 = vmatmul.mubr.bf16.vlgmr.msra.gmra.mrb[0].mxu1 %v73_v30 }
  0x32   :  { %128 = vmatpush1.bf16.xpose.msra.mxu1 %v59_v33  ;;  %159 = vmatprep.mubr.bf16.mxu1 %v76_v36 }
  0x33   :  { %200 = vmatmul.mubr.bf16.vlgmr.msra.gmra.mrb[0].mxu0 %v77_v32 }
  0x34   :  { %208 = vmatpush1.bf16.xpose.msra.mxu0 %v63_v35  ;;  %239 = vmatprep.mubr.bf16.mxu0 %v80_v37 }
  0x3d   :  { %160 = vmatmul.mubr.bf16.vlgmr.msra.gmra.mrb[0].mxu1 %v75_v40 }
  0x3f   :  { %240 = vmatmul.mubr.bf16.vlgmr.msra.gmra.mrb[0].mxu0 %v79_v41 }
  0xac   :  { %v85_v42 = vpop.permute.xlu0 %84 }
 0x110   :  { %v161_v43 = vpop.f32.mrb[0].mxu1 }
 0x111   :  { %v255_v44 = vadd.f32 %v161_v43, %v85_v42  ;;  %v163_v46 = vpop.f32.mrb[1].mxu1 }
 0x112   :  { %v241_v45 = vpop.f32.mrb[0].mxu0  ;;  %v164_v48 = vpop.f32.mrb[2].mxu1 }
 0x113   :  { %v243_v47 = vpop.f32.mrb[1].mxu0  ;;  %v256_v49 = vadd.f32 %v255_v44, %v241_v45  ;;  %v165_v51 = vpop.f32.mrb[3].mxu1 }
 0x114   :  { %v244_v50 = vpop.f32.mrb[2].mxu0 }
 0x115   :  { %v245_v52 = vpop.f32.mrb[3].mxu0  ;;  %248 = vst.msk [vmem:[%s377_s3] sm:$0xff] %vm247_vm0, %v256_v49 }
 0x116   :  { %253 = vsyncpa [#allocation3], 1 }
 0x117   :  { %254 = vsyncpa [#allocation5], 1 }

</bundles_post_ra>
